<compile_context>
chip_gen: v6e
topology: v6e:2x2x1
jax: 0.10.0
libtpu: 0.0.40
codegen_flags: <defaults>
</compile_context>

<pallas_src>
import functools

import jax
import jax.numpy as jnp
from jax import lax
from jax.experimental import pallas as pl
from jax.experimental.pallas import tpu as pltpu


def _round_up(x: int, m: int) -> int:
    return ((x + m - 1) // m) * m


def _semantic_loss_kernel(probs_ref, cons_ref, out_ref,
                          tot_acc, neg_acc, cnt_acc, *,
                          B: int, C: int, TB: int, TC: int,
                          mask_rows: bool, mask_cols: bool):
    bi = pl.program_id(0)
    cj = pl.program_id(1)

    @pl.when((bi == 0) & (cj == 0))
    def _init():
        tot_acc[...] = jnp.zeros_like(tot_acc)
        neg_acc[...] = jnp.zeros_like(neg_acc)
        cnt_acc[...] = jnp.zeros_like(cnt_acc)

    p = probs_ref[...].astype(jnp.float32)     # (TB, TC)
    cm = cons_ref[...] == 1                    # native-dtype compare, no cast

    # Mask out-of-bounds rows/cols of partial edge blocks. These are static
    # Python flags: no masking code is emitted when tiles divide evenly.
    if mask_rows or mask_cols:
        valid = None
        if mask_rows:
            ri = lax.broadcasted_iota(jnp.int32, (TB, TC), 0)
            valid = ri < (B - bi * TB)
        if mask_cols:
            ci = lax.broadcasted_iota(jnp.int32, (TB, TC), 1)
            cvalid = ci < (C - cj * TC)
            valid = cvalid if valid is None else (valid & cvalid)
        cm = cm & valid
        # masked -> p, unmasked-but-valid -> 1 - p, out-of-bounds -> 1 (log=0).
        arg = jnp.where(cm, p, jnp.where(valid, 1.0 - p, 1.0))
    else:
        arg = jnp.where(cm, p, 1.0 - p)

    # Single transcendental per element (EUP); everything else is VPU adds.
    val = jnp.log(arg)

    tot_acc[...] += val                        # sum of all log terms
    neg_acc[...] += jnp.where(cm, 0.0, val)    # sum log(1-p) over ~mask
    cnt_acc[...] += cm.astype(jnp.int32)       # exact count of mask

    @pl.when((bi == pl.num_programs(0) - 1) & (cj == pl.num_programs(1) - 1))
    def _finalize():
        total = jnp.sum(tot_acc[...])                            # lit + neg
        negated = jnp.sum(neg_acc[...])
        num_literals = jnp.sum(cnt_acc[...]).astype(jnp.float32)
        literals = total - negated
        out_ref[0, 0] = -(literals + num_literals * negated) / jnp.float32(B)


def _choose_tiles(B: int, C: int, probs_bytes: int, cons_bytes: int):
    # Lane (class) tile: full class axis if small, else 8*128 lanes.
    TC = C if C <= 1024 else 1024
    # VMEM bytes held live per batch row:
    #   double-buffered input blocks + 3 accumulators + ~4 f32 temporaries.
    per_row = TC * (2 * (probs_bytes + cons_bytes) + 3 * 4 + 4 * 4)
    budget = 16 * 1024 * 1024
    TB = max(32, min(budget // per_row, 8192))
    TB = (TB // 32) * 32                  # sublane-safe for f32/bf16/int8/bool
    TB = min(TB, _round_up(B, 32))        # never bigger than the rounded batch
    return TB, TC


def semantic_loss(probs: jax.Array, constraints: jax.Array) -> jax.Array:
    """probs: (B, C) float; constraints: (B, C) binary 0/1 (any dtype).

    Returns the scalar float32 semantic loss.
    """
    B, C = probs.shape
    assert constraints.shape == (B, C)

    TB, TC = _choose_tiles(B, C, probs.dtype.itemsize,
                           constraints.dtype.itemsize)
    nb = -(-B // TB)
    nc = -(-C // TC)

    kernel = functools.partial(
        _semantic_loss_kernel, B=B, C=C, TB=TB, TC=TC,
        mask_rows=(B % TB != 0), mask_cols=(C % TC != 0))

    out = pl.pallas_call(
        kernel,
        out_shape=jax.ShapeDtypeStruct((1, 1), jnp.float32),
        grid=(nb, nc),
        in_specs=[
            pl.BlockSpec((TB, TC), lambda i, j: (i, j)),
            pl.BlockSpec((TB, TC), lambda i, j: (i, j)),
        ],
        out_specs=pl.BlockSpec(memory_space=pltpu.MemorySpace.SMEM),
        scratch_shapes=[
            pltpu.VMEM((TB, TC), jnp.float32),   # sum of all log terms
            pltpu.VMEM((TB, TC), jnp.float32),   # sum log(1-p) over ~mask
            pltpu.VMEM((TB, TC), jnp.int32),     # exact count of mask
        ],
        compiler_params=pltpu.CompilerParams(
            dimension_semantics=("arbitrary", "arbitrary"),
            vmem_limit_bytes=32 * 1024 * 1024),
    )(probs, constraints)
    # TODO(synk): v7x-only dual-TensorCore split (leading "parallel" grid axis
    # with per-core partial (total, negated, count) outputs combined in the
    # wrapper) is not implemented; single-TC streaming is used on all chips.
    return out[0, 0]


def _semantic_loss_ref(probs, constraints):
    p = probs.astype(jnp.float32)
    mask = constraints == 1
    num_literals = jnp.sum(mask).astype(jnp.float32)
    literals = jnp.sum(jnp.where(mask, jnp.log(p), 0.0))
    negated = jnp.sum(jnp.where(mask, 0.0, jnp.log(1.0 - p)))
    return -(literals + num_literals * negated) / p.shape[0]


if __name__ == "__main__":
    key = jax.random.PRNGKey(0)
    k_p, k_c = jax.random.split(key)

    B, C = 4, 16  # (batch, num_classes)
    # probabilities in (0, 1)
    probs = jax.nn.sigmoid(jax.random.normal(k_p, (B, C), dtype=jnp.float32))
    # binary 0/1 constraints kept in their native float dtype (no wrapper cast)
    constraints = jax.random.bernoulli(k_c, 0.5, (B, C)).astype(jnp.float32)

    loss = semantic_loss(probs, constraints)
    jax.block_until_ready(loss)

    ref = _semantic_loss_ref(probs, constraints)
    assert jnp.allclose(loss, ref, rtol=1e-5, atol=1e-5), (loss, ref)

    print("KERNEL_OK")
</pallas_src>

<mosaic_0001>
module attributes {stable_mosaic.version = 11 : i64} {
  func.func @_semantic_loss_kernel(%arg0: i32, %arg1: i32, %arg2: memref<32x16xf32, #tpu.memory_space<vmem>>, %arg3: memref<32x16xf32, #tpu.memory_space<vmem>>, %arg4: memref<1x1xf32, #tpu.memory_space<smem>>, %arg5: memref<32x16xf32, #tpu.memory_space<vmem>>, %arg6: memref<32x16xf32, #tpu.memory_space<vmem>>, %arg7: memref<32x16xi32, #tpu.memory_space<vmem>>) attributes {dimension_semantics = [#tpu.dimension_semantics<arbitrary>, #tpu.dimension_semantics<arbitrary>], iteration_bounds = array<i64: 1, 1>, scalar_prefetch = 0 : i64, scratch_operands = 3 : i64, tpu.core_type = #tpu.core_type<tc>, window_params = [{transform_indices = @transform_0, window_bounds = array<i64: 32, 16>}, {transform_indices = @transform_1, window_bounds = array<i64: 32, 16>}, {transform_indices = @transform_2, window_bounds = array<i64: 1, 1>}]} {
    %c0_i32 = arith.constant 0 : i32
    %0 = arith.cmpi eq, %arg0, %c0_i32 : i32
    %c0_i32_0 = arith.constant 0 : i32
    %1 = arith.cmpi eq, %arg1, %c0_i32_0 : i32
    %2 = arith.andi %0, %1 : i1
    %3 = arith.extui %2 : i1 to i32
    %c0_i32_1 = arith.constant 0 : i32
    %4 = arith.cmpi ne, %3, %c0_i32_1 : i32
    scf.if %4 {
      %cst_23 = arith.constant 0.000000e+00 : f32
      %38 = vector.broadcast %cst_23 : f32 to vector<32x16xf32>
      %c0_24 = arith.constant 0 : index
      %c0_25 = arith.constant 0 : index
      %39 = vector.load %arg5[%c0_24, %c0_25] : memref<32x16xf32, #tpu.memory_space<vmem>>, vector<32x16xf32>
      tpu.vector_store %arg5[%c0_24, %c0_25], %38 {strides = array<i32>} : memref<32x16xf32, #tpu.memory_space<vmem>>, vector<32x16xf32>,
      %cst_26 = arith.constant 0.000000e+00 : f32
      %40 = vector.broadcast %cst_26 : f32 to vector<32x16xf32>
      %c0_27 = arith.constant 0 : index
      %c0_28 = arith.constant 0 : index
      %41 = vector.load %arg6[%c0_27, %c0_28] : memref<32x16xf32, #tpu.memory_space<vmem>>, vector<32x16xf32>
      tpu.vector_store %arg6[%c0_27, %c0_28], %40 {strides = array<i32>} : memref<32x16xf32, #tpu.memory_space<vmem>>, vector<32x16xf32>,
      %c0_i32_29 = arith.constant 0 : i32
      %42 = vector.broadcast %c0_i32_29 : i32 to vector<32x16xi32>
      %c0_30 = arith.constant 0 : index
      %c0_31 = arith.constant 0 : index
      %43 = vector.load %arg7[%c0_30, %c0_31] : memref<32x16xi32, #tpu.memory_space<vmem>>, vector<32x16xi32>
      tpu.vector_store %arg7[%c0_30, %c0_31], %42 {strides = array<i32>} : memref<32x16xi32, #tpu.memory_space<vmem>>, vector<32x16xi32>,
    } else {
    }
    %c0 = arith.constant 0 : index
    %c0_2 = arith.constant 0 : index
    %5 = vector.load %arg2[%c0, %c0_2] : memref<32x16xf32, #tpu.memory_space<vmem>>, vector<32x16xf32>
    %c0_3 = arith.constant 0 : index
    %c0_4 = arith.constant 0 : index
    %6 = vector.load %arg3[%c0_3, %c0_4] : memref<32x16xf32, #tpu.memory_space<vmem>>, vector<32x16xf32>
    %cst = arith.constant 1.000000e+00 : f32
    %7 = vector.broadcast %cst : f32 to vector<32x16xf32>
    %8 = arith.cmpf oeq, %6, %7 : vector<32x16xf32>
    %9 = tpu.iota {dimensions = array<i32: 0>} : vector<32x16xi32>
    %c32_i32 = arith.constant 32 : i32
    %10 = arith.muli %arg0, %c32_i32 : i32
    %c4_i32 = arith.constant 4 : i32
    %11 = arith.subi %c4_i32, %10 : i32
    %12 = vector.broadcast %11 : i32 to vector<32x16xi32>
    %13 = arith.cmpi slt, %9, %12 : vector<32x16xi32>
    %14 = arith.andi %8, %13 : vector<32x16xi1>
    %cst_5 = arith.constant 1.000000e+00 : f32
    %15 = vector.broadcast %cst_5 : f32 to vector<32x16xf32>
    %16 = arith.subf %15, %5 : vector<32x16xf32>
    %cst_6 = arith.constant 1.000000e+00 : f32
    %17 = vector.broadcast %cst_6 : f32 to vector<32x16xf32>
    %18 = arith.select %13, %16, %17 : vector<32x16xi1>, vector<32x16xf32>
    %19 = arith.select %14, %5, %18 : vector<32x16xi1>, vector<32x16xf32>
    %20 = math.log %19 : vector<32x16xf32>
    %c0_7 = arith.constant 0 : index
    %c0_8 = arith.constant 0 : index
    %21 = vector.load %arg5[%c0_7, %c0_8] : memref<32x16xf32, #tpu.memory_space<vmem>>, vector<32x16xf32>
    %22 = arith.addf %21, %20 : vector<32x16xf32>
    %c0_9 = arith.constant 0 : index
    %c0_10 = arith.constant 0 : index
    %23 = vector.load %arg5[%c0_9, %c0_10] : memref<32x16xf32, #tpu.memory_space<vmem>>, vector<32x16xf32>
    tpu.vector_store %arg5[%c0_9, %c0_10], %22 {strides = array<i32>} : memref<32x16xf32, #tpu.memory_space<vmem>>, vector<32x16xf32>,
    %c0_11 = arith.constant 0 : index
    %c0_12 = arith.constant 0 : index
    %24 = vector.load %arg6[%c0_11, %c0_12] : memref<32x16xf32, #tpu.memory_space<vmem>>, vector<32x16xf32>
    %cst_13 = arith.constant 0.000000e+00 : f32
    %25 = vector.broadcast %cst_13 : f32 to vector<32x16xf32>
    %26 = arith.select %14, %25, %20 : vector<32x16xi1>, vector<32x16xf32>
    %27 = arith.addf %24, %26 : vector<32x16xf32>
    %c0_14 = arith.constant 0 : index
    %c0_15 = arith.constant 0 : index
    %28 = vector.load %arg6[%c0_14, %c0_15] : memref<32x16xf32, #tpu.memory_space<vmem>>, vector<32x16xf32>
    tpu.vector_store %arg6[%c0_14, %c0_15], %27 {strides = array<i32>} : memref<32x16xf32, #tpu.memory_space<vmem>>, vector<32x16xf32>,
    %c0_16 = arith.constant 0 : index
    %c0_17 = arith.constant 0 : index
    %29 = vector.load %arg7[%c0_16, %c0_17] : memref<32x16xi32, #tpu.memory_space<vmem>>, vector<32x16xi32>
    %30 = arith.extui %14 : vector<32x16xi1> to vector<32x16xi32>
    %31 = arith.addi %29, %30 : vector<32x16xi32>
    %c0_18 = arith.constant 0 : index
    %c0_19 = arith.constant 0 : index
    %32 = vector.load %arg7[%c0_18, %c0_19] : memref<32x16xi32, #tpu.memory_space<vmem>>, vector<32x16xi32>
    tpu.vector_store %arg7[%c0_18, %c0_19], %31 {strides = array<i32>} : memref<32x16xi32, #tpu.memory_space<vmem>>, vector<32x16xi32>,
    %c0_i32_20 = arith.constant 0 : i32
    %33 = arith.cmpi eq, %arg0, %c0_i32_20 : i32
    %c0_i32_21 = arith.constant 0 : i32
    %34 = arith.cmpi eq, %arg1, %c0_i32_21 : i32
    %35 = arith.andi %33, %34 : i1
    %36 = arith.extui %35 : i1 to i32
    %c0_i32_22 = arith.constant 0 : i32
    %37 = arith.cmpi ne, %36, %c0_i32_22 : i32
    scf.if %37 {
      %c0_23 = arith.constant 0 : index
      %c0_24 = arith.constant 0 : index
      %38 = vector.load %arg5[%c0_23, %c0_24] : memref<32x16xf32, #tpu.memory_space<vmem>>, vector<32x16xf32>
      %39 = vector.shape_cast %38 : vector<32x16xf32> to vector<1x32x16xf32>
      %cst_25 = arith.constant dense<0.000000e+00> : vector<1xf32>
      %40 = vector.multi_reduction <add>, %39, %cst_25 [1, 2] : vector<1x32x16xf32> to vector<1xf32>
      %41 = vector.shape_cast %40 : vector<1xf32> to vector<1x1x1xf32>
      %42 = vector.extract %41[0, 0, 0] : f32 from vector<1x1x1xf32>
      %c0_26 = arith.constant 0 : index
      %c0_27 = arith.constant 0 : index
      %43 = vector.load %arg6[%c0_26, %c0_27] : memref<32x16xf32, #tpu.memory_space<vmem>>, vector<32x16xf32>
      %44 = vector.shape_cast %43 : vector<32x16xf32> to vector<1x32x16xf32>
      %cst_28 = arith.constant dense<0.000000e+00> : vector<1xf32>
      %45 = vector.multi_reduction <add>, %44, %cst_28 [1, 2] : vector<1x32x16xf32> to vector<1xf32>
      %46 = vector.shape_cast %45 : vector<1xf32> to vector<1x1x1xf32>
      %47 = vector.extract %46[0, 0, 0] : f32 from vector<1x1x1xf32>
      %c0_29 = arith.constant 0 : index
      %c0_30 = arith.constant 0 : index
      %48 = vector.load %arg7[%c0_29, %c0_30] : memref<32x16xi32, #tpu.memory_space<vmem>>, vector<32x16xi32>
      %49 = vector.shape_cast %48 : vector<32x16xi32> to vector<1x32x16xi32>
      %cst_31 = arith.constant dense<0> : vector<1xi32>
      %50 = vector.multi_reduction <add>, %49, %cst_31 [1, 2] : vector<1x32x16xi32> to vector<1xi32>
      %51 = vector.shape_cast %50 : vector<1xi32> to vector<1x1x1xi32>
      %52 = vector.extract %51[0, 0, 0] : i32 from vector<1x1x1xi32>
      %53 = arith.sitofp %52 : i32 to f32
      %54 = arith.subf %42, %47 : f32
      %55 = arith.mulf %53, %47 : f32
      %56 = arith.addf %54, %55 : f32
      %cst_32 = arith.constant 0.000000e+00 : f32
      %57 = arith.subf %cst_32, %56 : f32
      %cst_33 = arith.constant 4.000000e+00 : f32
      %58 = arith.divf %57, %cst_33 : f32
      %c0_34 = arith.constant 0 : index
      %c0_35 = arith.constant 0 : index
      %59 = memref.load %arg4[%c0_34, %c0_35] : memref<1x1xf32, #tpu.memory_space<smem>>
      memref.store %58, %arg4[%c0_34, %c0_35] : memref<1x1xf32, #tpu.memory_space<smem>>
    } else {
    }
    return
  }
  func.func @transform_0(%arg0: i32, %arg1: i32) -> (i32, i32) {
    %c0_i32 = arith.constant 0 : i32
    return %arg0, %arg1 : i32, i32
  }
  func.func @transform_1(%arg0: i32, %arg1: i32) -> (i32, i32) {
    %c0_i32 = arith.constant 0 : i32
    return %arg0, %arg1 : i32, i32
  }
  func.func @transform_2(%arg0: i32, %arg1: i32) -> (i32, i32) {
    %c0_i32 = arith.constant 0 : i32
    %c0_i32_0 = arith.constant 0 : i32
    %c0_i32_1 = arith.constant 0 : i32
    return %c0_i32, %c0_i32_0 : i32, i32
  }
}

</mosaic_0001>

<bundles_post_ra>
// kernel: tpu_custom_call.1
= control target key start
LH: loop header
LB: loop body
LE: loop exit
PB: predicated region body
PF: predicated region fallthrough
CT: control target
= control target key end

     0   :  { %7 = vsyncpa [#allocation6], 0  ;;  %s395_s0 = inlined_call_operand.hbm [shape: f32[4,16], index: 0, kind: input, shape index: {}]   ;;  %s396_s1 = inlined_call_operand.hbm [shape: f32[4,16], index: 1, kind: input, shape index: {}]   ;;  %s397_s2 = inlined_call_operand.hbm [shape: f32[1,1], index: 2, kind: output, shape index: {}]  }
   0x1   :  { %8 = vsyncpa [#allocation9], 0 }
   0x2   :  { %9 = vsyncpa [#allocation7], 0 }
   0x3   :  { %14 = vsyncadd [#allocation6], 448  ;;  %s318_s9 = smov [#allocation5]  }
   0x4   :  { %s15_s10 = sshll.u32 %s318_s9, 4  ;;  %s16_s10 = int_to_ptr.vmem [resolvable:$true] %s15_s10 }
   0x5   :  { %s272_s11 = scalar_lea.vmem %s16_s10, 64  ;;  %s276_s12 = scalar_lea.vmem %s16_s10, 512 }
   0x6   :  { %p273_p0 = scmp.ne.s32.totalorder %s16_s10, %s272_s11  ;;  %p277_p1 = scmp.lt.s32.totalorder %s16_s10, %s16_s10 }
   0x7   :  { %p278_p2 = scmp.lt.s32.totalorder %s276_s12, %s272_s11 }
   0x9   :  { %p279_p3 = por %p278_p2, %p277_p1 }
   0xb   :  { %p280_p4 = pnand %p279_p3, %p273_p0 }
   0xd   :  { %283 = shalt.err (!%p280_p4)
}
   0xe   :  { %s319_s13 = smov 64   ;;  %s320_s14 = smov 4  }
   0xf   :  { %21 = dma.hbm_to_vmem [thread:$0]  %s395_s0, 64, %s16_s10, [#allocation6], %s319_s13, %s319_s13, %s320_s14  }
  0x10   :  { %26 = vsyncadd [#allocation9], 448  ;;  %s321_s17 = smov [#allocation8]  }
  0x11   :  { %s27_s18 = sshll.u32 %s321_s17, 4  ;;  %s28_s18 = int_to_ptr.vmem [resolvable:$true] %s27_s18 }
  0x12   :  { %s292_s19 = scalar_lea.vmem %s28_s18, 64  ;;  %s296_s20 = scalar_lea.vmem %s28_s18, 512 }
  0x13   :  { %p293_p5 = scmp.ne.s32.totalorder %s28_s18, %s292_s19  ;;  %p297_p6 = scmp.lt.s32.totalorder %s28_s18, %s28_s18 }
  0x14   :  { %p298_p7 = scmp.lt.s32.totalorder %s296_s20, %s292_s19 }
  0x16   :  { %p299_p8 = por %p298_p7, %p297_p6 }
  0x18   :  { %p300_p9 = pnand %p299_p8, %p293_p5 }
  0x1a   :  { %303 = shalt.err (!%p300_p9)
}
  0x1b   :  { %33 = dma.hbm_to_vmem [thread:$0]  %s396_s1, 64, %s28_s18, [#allocation9], %s319_s13, %s319_s13, %s320_s14  }
  0x1c   :  { %312 = dma.done.wait [#allocation6], 512  }
  0x1d   :  { %313 = vsyncadd [#allocation6], 4294966784 }
  0x1e   :  { %314 = dma.done.wait [#allocation9], 512  }
  0x1f   :  { %315 = vsyncadd [#allocation9], 4294966784  ;;  %vm46_vm0 = vcmask 130048   ;;  %v71_v0 = vlaneseq  ;;  %v322_v1 = vmov 0   ;;  %v323_v2 = vmov 0.0   ;;  %v59_v4 = vld [vmem:[#allocation5] sm:$0xff] }
  0x20   :  { %55 = vst.msk [vmem:[#allocation4] sm:$0xff] %vm46_vm0, %v322_v1  ;;  %56 = vst.msk [vmem:[#allocation4 + $0x8] sm:$0xff] %vm46_vm0, %v322_v1  ;;  %v63_v5 = vld [vmem:[#allocation8] sm:$0xff]  ;;  %v87_v6 = vsub.f32 1.0, %v59_v4  ;;  %s324_s30 = smov [#allocation10]  }
  0x21   :  { %57 = vst.msk [vmem:[#allocation4 + $0x10] sm:$0xff] %vm46_vm0, %v322_v1  ;;  %58 = vst.msk [vmem:[#allocation4 + $0x18] sm:$0xff] %vm46_vm0, %v322_v1  ;;  %v72_v3 = vshrl.u32 %v71_v0, 7  ;;  %vm67_vm2 = vcmp.eq.f32.partialorder %v63_v5, 1.0 }
  0x22   :  { %47 = vst.msk [vmem:[#allocation2] sm:$0xff] %vm46_vm0, %v323_v2  ;;  %48 = vst.msk [vmem:[#allocation2 + $0x8] sm:$0xff] %vm46_vm0, %v323_v2 }
  0x23   :  { %49 = vst.msk [vmem:[#allocation2 + $0x10] sm:$0xff] %vm46_vm0, %v323_v2  ;;  %50 = vst.msk [vmem:[#allocation2 + $0x18] sm:$0xff] %vm46_vm0, %v323_v2  ;;  %vm79_vm1 = vcmp.lt.s32.totalorder %v72_v3, 4 }
  0x24   :  { %51 = vst.msk [vmem:[#allocation3] sm:$0xff] %vm46_vm0, %v323_v2  ;;  %52 = vst.msk [vmem:[#allocation3 + $0x8] sm:$0xff] %vm46_vm0, %v323_v2  ;;  %v91_v12 = vsel %vm79_vm1, %v87_v6, 1.0 }
  0x25   :  { %53 = vst.msk [vmem:[#allocation3 + $0x10] sm:$0xff] %vm46_vm0, %v323_v2  ;;  %54 = vst.msk [vmem:[#allocation3 + $0x18] sm:$0xff] %vm46_vm0, %v323_v2 }
  0x26   :  { %vm358_vm3 = vmand %vm67_vm2, %vm79_vm1 }
  0x27   :  { %v136_v7 = vld [vmem:[#allocation4] sm:$0xff]  ;;  %v137_v8 = vld [vmem:[#allocation4 + $0x8] sm:$0xff]  ;;  %v140_v13 = vsel %vm358_vm3, 1, %v322_v1  ;;  %v95_v18 = vsel %vm358_vm3, %v59_v4, %v91_v12 }
  0x28   :  { %v138_v9 = vld [vmem:[#allocation4 + $0x10] sm:$0xff]  ;;  %v139_v11 = vld [vmem:[#allocation4 + $0x18] sm:$0xff]  ;;  %149 = vst.msk [vmem:[#allocation4 + $0x8] sm:$0xff] %vm46_vm0, %v137_v8  ;;  %v144_v17 = vadd.s32 %v140_v13, %v136_v7  ;;  %262 = vlog2.f32 %v95_v18 }
  0x29   :  { %150 = vst.msk [vmem:[#allocation4 + $0x10] sm:$0xff] %vm46_vm0, %v138_v9  ;;  %151 = vst.msk [vmem:[#allocation4 + $0x18] sm:$0xff] %vm46_vm0, %v139_v11  ;;  %v108_v14 = vld [vmem:[#allocation2 + $0x8] sm:$0xff]  ;;  %v107_v34 = vld [vmem:[#allocation2] sm:$0xff] }
  0x2a   :  { %v109_v15 = vld [vmem:[#allocation2 + $0x10] sm:$0xff]  ;;  %v110_v16 = vld [vmem:[#allocation2 + $0x18] sm:$0xff]  ;;  %117 = vst.msk [vmem:[#allocation2 + $0x8] sm:$0xff] %vm46_vm0, %v108_v14  ;;  %148 = vst.msk [vmem:[#allocation4] sm:$0xff] %vm46_vm0, %v144_v17 }
  0x2b   :  { %118 = vst.msk [vmem:[#allocation2 + $0x10] sm:$0xff] %vm46_vm0, %v109_v15  ;;  %119 = vst.msk [vmem:[#allocation2 + $0x18] sm:$0xff] %vm46_vm0, %v110_v16  ;;  %v121_v19 = vld [vmem:[#allocation3 + $0x8] sm:$0xff]  ;;  %v120_v38 = vld [vmem:[#allocation3] sm:$0xff] }
  0x2c   :  { %v122_v20 = vld [vmem:[#allocation3 + $0x10] sm:$0xff]  ;;  %v123_v21 = vld [vmem:[#allocation3 + $0x18] sm:$0xff]  ;;  %133 = vst.msk [vmem:[#allocation3 + $0x8] sm:$0xff] %vm46_vm0, %v121_v19 }
  0x2d   :  { %134 = vst.msk [vmem:[#allocation3 + $0x10] sm:$0xff] %vm46_vm0, %v122_v20  ;;  %135 = vst.msk [vmem:[#allocation3 + $0x18] sm:$0xff] %vm46_vm0, %v123_v21 }
  0x2f   :  { %v195_v22 = vld [vmem:[#allocation4 + $0x8] sm:$0xff] }
  0x30   :  { %v196_v23 = vld [vmem:[#allocation4 + $0x10] sm:$0xff]  ;;  %v197_v24 = vld [vmem:[#allocation4 + $0x18] sm:$0xff]  ;;  %v199_v27 = vsel %vm46_vm0, %v195_v22, 0 }
  0x31   :  { %v200_v25 = vsel %vm46_vm0, %v196_v23, 0  ;;  %v201_v26 = vsel %vm46_vm0, %v197_v24, 0  ;;  %v194_v28 = vld [vmem:[#allocation4] sm:$0xff]  ;;  %v155_v44 = vld [vmem:[#allocation2 + $0x8] sm:$0xff] }
  0x32   :  { %v203_v29 = vadd.s32 %v201_v26, %v200_v25  ;;  %v198_v30 = vsel %vm46_vm0, %v194_v28, 0  ;;  %v156_v46 = vld [vmem:[#allocation2 + $0x10] sm:$0xff]  ;;  %v159_v47 = vsel %vm46_vm0, %v155_v44, 0.0  ;;  %v157_v50 = vld [vmem:[#allocation2 + $0x18] sm:$0xff] }
  0x33   :  { %v202_v31 = vadd.s32 %v199_v27, %v198_v30  ;;  %v175_v45 = vld [vmem:[#allocation3 + $0x8] sm:$0xff]  ;;  %v161_v53 = vsel %vm46_vm0, %v156_v46, 0.0  ;;  %v163_v59 = vsel %vm46_vm0, %v157_v50, 0.0 }
  0x34   :  { %v176_v48 = vld [vmem:[#allocation3 + $0x10] sm:$0xff]  ;;  %v179_v51 = vsel %vm46_vm0, %v175_v45, 0.0  ;;  %v177_v56 = vld [vmem:[#allocation3 + $0x18] sm:$0xff] }
  0x35   :  { %v204_v32 = vadd.s32 %v203_v29, %v202_v31  ;;  %v263_v33 = vpop.eup %262  ;;  %v181_v58 = vsel %vm46_vm0, %v176_v48, 0.0  ;;  %v183_v63 = vsel %vm46_vm0, %v177_v56, 0.0 }
  0x36   :  { %v100_v37 = vmul.f32 0.6931472, %v263_v33 }
  0x37   :  { %v206_v35 = vshrl.u32 %v204_v32, 16  ;;  %v205_v36 = vand.u32 65535, %v204_v32 }
  0x38   :  { %v111_v40 = vadd.f32 %v107_v34, %v100_v37  ;;  %v124_v41 = vsel %vm358_vm3, 0.0, %v100_v37 }
  0x39   :  { %v208_v39 = vcvt.s32.f32 %v206_v35  ;;  %v128_v42 = vadd.f32 %v124_v41, %v120_v38  ;;  %v207_v43 = vcvt.s32.f32 %v205_v36 }
  0x3a   :  { %116 = vst.msk [vmem:[#allocation2] sm:$0xff] %vm46_vm0, %v111_v40 }
  0x3b   :  { %211 = vadd.xlane.f32.xlu0 %v208_v39  ;;  %132 = vst.msk [vmem:[#allocation3] sm:$0xff] %vm46_vm0, %v128_v42 }
  0x3f   :  { %209 = vadd.xlane.f32.xlu0 %v207_v43 }
  0x41   :  { %v154_v49 = vld [vmem:[#allocation2] sm:$0xff] }
  0x42   :  { %v158_v52 = vsel %vm46_vm0, %v154_v49, 0.0  ;;  %v174_v54 = vld [vmem:[#allocation3] sm:$0xff] }
  0x43   :  { %v160_v55 = vadd.f32 %v159_v47, %v158_v52  ;;  %v178_v57 = vsel %vm46_vm0, %v174_v54, 0.0 }
  0x44   :  { %v180_v60 = vadd.f32 %v179_v51, %v178_v57 }
  0x45   :  { %v162_v61 = vadd.f32 %v161_v53, %v160_v55 }
  0x46   :  { %v182_v62 = vadd.f32 %v181_v58, %v180_v60 }
  0x47   :  { %v164_v0 = vadd.f32 %v163_v59, %v162_v61 }
  0x48   :  { %v184_v1 = vadd.f32 %v183_v63, %v182_v62 }
  0x49   :  { %165 = vadd.xlane.f32.xlu1 %v164_v0 }
  0x4d   :  { %185 = vadd.xlane.f32.xlu1 %v184_v1 }
  0xc4   :  { %v212_v2 = vpop.xlane.xlu0 %211 }
  0xc5   :  { %v214_v3 = vcvt.f32.s32 %v212_v2 }
  0xc7   :  { %v215_v4 = vshll.u32 %v214_v3, 16 }
  0xc8   :  { %v210_v5 = vpop.xlane.xlu0 %209 }
  0xc9   :  { %v213_v6 = vcvt.f32.s32 %v210_v5 }
  0xcb   :  { %v216_v7 = vadd.s32 %v215_v4, %v213_v6 }
  0xcd   :  { %v217_v8 = vrot.slane %v216_v7, 4 }
  0xcf   :  { %v218_v9 = vadd.s32 %v217_v8, %v216_v7 }
  0xd1   :  { %v219_v14 = vrot.slane %v218_v9, 2 }
  0xd2   :  { %v166_v10 = vpop.xlane.xlu1 %165 }
  0xd3   :  { %v167_v11 = vrot.slane %v166_v10, 4  ;;  %v220_v19 = vadd.s32 %v219_v14, %v218_v9 }
  0xd5   :  { %v168_v12 = vadd.f32 %v167_v11, %v166_v10  ;;  %v221_v24 = vrot.slane %v220_v19, 1 }
  0xd6   :  { %v186_v13 = vpop.xlane.xlu1 %185 }
  0xd7   :  { %v169_v15 = vrot.slane %v168_v12, 2  ;;  %v187_v16 = vrot.slane %v186_v13, 4  ;;  %v222_v27 = vadd.s32 %v221_v24, %v220_v19 }
  0xd9   :  { %v188_v17 = vadd.f32 %v187_v16, %v186_v13  ;;  %v170_v18 = vadd.f32 %v169_v15, %v168_v12 }
  0xdb   :  { %v189_v20 = vrot.slane %v188_v17, 2  ;;  %v171_v21 = vrot.slane %v170_v18, 1 }
  0xdd   :  { %v190_v22 = vadd.f32 %v189_v20, %v188_v17  ;;  %v172_v23 = vadd.f32 %v171_v21, %v170_v18 }
  0xdf   :  { %249 = vpush %v172_v23  ;;  %v191_v25 = vrot.slane %v190_v22, 1 }
  0xe1   :  { %v192_v26 = vadd.f32 %v191_v25, %v190_v22 }
  0xe3   :  { %251 = vpush %v192_v26 }
  0xe4   :  { %253 = vpush %v222_v27 }
 0x110   :  { %s250_s0 = spop %249 }
 0x114   :  { %s252_s1 = spop %251 }
 0x115   :  { %s254_s23 = spop %253  ;;  %s225_s25 = ssub.f32 %s250_s0, %s252_s1 }
 0x116   :  { %s224_s24 = scvt.s32.f32 %s254_s23 }
 0x118   :  { %s226_s26 = smul.f32 %s252_s1, %s224_s24 }
 0x11a   :  { %s227_s27 = sadd.f32 %s226_s26, %s225_s25 }
 0x11c   :  { %s228_s28 = ssub.f32 0.0, %s227_s27 }
 0x11e   :  { %s231_s29 = smul.f32 0.25, %s228_s28 }
 0x120   :  { %233 = sst [smem:[#allocation10]] %s231_s29 }
 0x121   :  { %241 = dma.smem_to_hbm %s324_s30, 16, %s397_s2, [#allocation7]  }
 0x122   :  { %316 = dma.done.wait [#allocation7], 16  }
 0x123   :  { %317 = vsyncadd [#allocation7], 4294967280 }
 0x124   :  { %245 = sfence }
 0x125   :  { %246 = vsyncpa [#allocation6], 1 }
 0x126   :  { %247 = vsyncpa [#allocation9], 1 }
 0x127   :  { %248 = vsyncpa [#allocation7], 1 }

</bundles_post_ra>
